<compile_context>
chip_gen: v7x
topology: tpu7x:2x2x1
jax: 0.10.0
libtpu: 0.0.40
codegen_flags: <defaults>
</compile_context>

<pallas_src>
import jax
import jax.numpy as jnp
from jax.experimental import pallas as pl
from jax.experimental.pallas import tpu as pltpu

# ---------------------------------------------------------------------------
# Problem sizes (KarateClub: 34 nodes, 34 features, 4 classes)
# ---------------------------------------------------------------------------
N_NODES = 34          # number of graph nodes
N_FEATS = 34          # dataset.num_features
N_CLASSES = 4         # dataset.num_classes
H1, H2, H3 = 4, 4, 2  # GCNConv output dims (conv1, conv2, conv3)

# Padded (TPU-friendly) sizes
NV = 48               # padded node rows (multiple of 16 for bf16 sublanes, >= 34); also A's K dim
FEAT_P = 64           # padded feature dim (X lanes / W1 contraction dim)
HP = 8                # padded hidden / class lane width (covers H1=H2=4, H3=2, N_CLASSES=4)

# Packed small-parameter slab layout: (32, HP) f32
SLAB_ROWS = 32
R_W2, R_W3, R_WC, R_B = 0, 8, 16, 24   # biases b1,b2,b3,bc live at rows 24..27

# Static packing invariants (review correctness concern)
assert N_NODES <= NV and NV % 16 == 0
assert N_FEATS <= FEAT_P
assert max(H1, H2, H3, N_CLASSES) <= HP
assert R_B + 4 <= SLAB_ROWS


# ---------------------------------------------------------------------------
# Pallas kernel: fused 3-layer GCN + linear classifier (one graph per grid step)
# ---------------------------------------------------------------------------
def gcn_kernel(a_ref, x_ref, w1_ref, slab_ref, out_ref):
    f32, bf16 = jnp.float32, jnp.bfloat16

    a = a_ref[...]                                   # (NV, NV)  bf16, rows/cols >= 34 zero
    slab = slab_ref[...]                             # (32, HP)  f32
    w2 = slab[R_W2:R_W2 + HP, :].astype(bf16)        # (HP, HP), real (4,4) top-left
    w3 = slab[R_W3:R_W3 + HP, :].astype(bf16)        # (HP, HP), real (4,2) top-left
    wc = slab[R_WC:R_WC + HP, :].astype(bf16)        # (HP, HP), real (2,4) top-left
    b1 = slab[R_B + 0:R_B + 1, :]                    # (1, HP)
    b2 = slab[R_B + 1:R_B + 2, :]
    b3 = slab[R_B + 2:R_B + 3, :]
    bc = slab[R_B + 3:R_B + 4, :]

    # Valid-node row mask: keeps padded rows (>= N_NODES) exactly zero after bias/tanh.
    rows = jax.lax.broadcasted_iota(jnp.int32, (NV, HP), 0)
    mask = (rows < N_NODES).astype(f32)

    def propagate(hw_f32, b_row):
        # tanh(A_hat @ (H @ W) + b); rhs fed as a bf16 vreg value (no scratch round-trip).
        z = jnp.dot(a, hw_f32.astype(bf16), preferred_element_type=f32)   # (NV, HP) f32
        return jnp.tanh(z + mask * b_row)

    # ---- conv1: tanh(A @ (X @ W1) + b1) ----
    xw = jnp.dot(x_ref[...], w1_ref[...], preferred_element_type=f32)     # (NV, HP) f32
    h = propagate(xw, b1)                                                 # lanes 0..3 live

    # ---- conv2: tanh(A @ (H1 @ W2) + b2) ----
    h = propagate(jnp.dot(h.astype(bf16), w2, preferred_element_type=f32), b2)

    # ---- conv3: tanh(A @ (H2 @ W3) + b3) ----
    h3 = propagate(jnp.dot(h.astype(bf16), w3, preferred_element_type=f32), b3)  # lanes 0..1

    # ---- classifier: logits = H3 @ Wc + bc ----
    logits = jnp.dot(h3.astype(bf16), wc, preferred_element_type=f32) + mask * bc

    out_ref[0, :, :] = logits     # plane 0: classifier logits (lanes 0..3 real)
    out_ref[1, :, :] = h3         # plane 1: last hidden state (lanes 0..1 real)


# Advisory cost estimate (per-graph numbers).
_FLOPS_G = 2 * NV * FEAT_P * HP + 3 * 2 * NV * NV * HP + 3 * 2 * NV * HP * HP
_TRANS_G = 3 * NV * HP
_BYTES_G = NV * NV * 2 + NV * FEAT_P * 2 + 2 * NV * HP * 4
_BYTES_S = FEAT_P * HP * 2 + SLAB_ROWS * HP * 4


@jax.jit
def gcn_forward(a_pad, x_pad, w1_pad, slab):
    """a_pad: (B, NV, NV) bf16, x_pad: (B, NV, FEAT_P) bf16, w1_pad: (FEAT_P, HP) bf16,
    slab: (SLAB_ROWS, HP) f32  ->  (logits (B, 34, 4), h (B, 34, 2))"""
    B = a_pad.shape[0]
    out_pad = pl.pallas_call(
        gcn_kernel,
        out_shape=jax.ShapeDtypeStruct((B, 2, NV, HP), jnp.float32),
        grid=(B,),
        in_specs=[
            pl.BlockSpec((None, NV, NV), lambda b: (b, 0, 0)),        # A_hat  (per graph)
            pl.BlockSpec((None, NV, FEAT_P), lambda b: (b, 0, 0)),    # X      (per graph)
            pl.BlockSpec((FEAT_P, HP), lambda b: (0, 0)),             # W1     (shared)
            pl.BlockSpec((SLAB_ROWS, HP), lambda b: (0, 0)),          # packed W2/W3/Wc + biases
        ],
        out_specs=pl.BlockSpec((None, 2, NV, HP), lambda b: (b, 0, 0, 0)),
        compiler_params=pltpu.CompilerParams(dimension_semantics=("parallel",)),
        cost_estimate=pl.CostEstimate(
            flops=B * _FLOPS_G,
            transcendentals=B * _TRANS_G,
            bytes_accessed=B * _BYTES_G + _BYTES_S),
    )(a_pad, x_pad, w1_pad, slab)

    logits = out_pad[:, 0, :N_NODES, :N_CLASSES]
    h = out_pad[:, 1, :N_NODES, :H3]
    return logits, h


# ---------------------------------------------------------------------------
# Plain-JAX glue: normalized adjacency, padding, parameter init, packing
# ---------------------------------------------------------------------------
def build_normalized_adjacency(edge_index, num_nodes):
    """Dense D^-1/2 (A + I) D^-1/2 from a (2, E) edge_index (GCN normalization)."""
    src, dst = edge_index[0], edge_index[1]
    a = jnp.zeros((num_nodes, num_nodes), jnp.float32)
    a = a.at[src, dst].set(1.0)
    a = jnp.maximum(a, a.T)                                  # symmetrize (undirected graph)
    eye = jnp.eye(num_nodes, dtype=jnp.float32)
    a = a * (1.0 - eye) + eye                                # exactly one self-loop per node
    deg = a.sum(axis=1)
    dinv = jnp.where(deg > 0, 1.0 / jnp.sqrt(deg), 0.0)
    return dinv[:, None] * a * dinv[None, :]


def pad2(x, rows, cols, dtype=jnp.float32):
    out = jnp.zeros((rows, cols), dtype)
    return out.at[:x.shape[0], :x.shape[1]].set(x.astype(dtype))


def init_params(key):
    """Deterministic parameter init matching the module's shapes (unpadded)."""
    ks = jax.random.split(key, 5)

    def glorot(k, fan_in, fan_out):
        lim = jnp.sqrt(6.0 / (fan_in + fan_out))
        return jax.random.uniform(k, (fan_in, fan_out), jnp.float32, -lim, lim)

    w1 = glorot(ks[0], N_FEATS, H1); b1 = jnp.zeros((H1,), jnp.float32)
    w2 = glorot(ks[1], H1, H2);      b2 = jnp.zeros((H2,), jnp.float32)
    w3 = glorot(ks[2], H2, H3);      b3 = jnp.zeros((H3,), jnp.float32)
    wc = glorot(ks[3], H3, N_CLASSES)
    bc = jax.random.uniform(ks[4], (N_CLASSES,), jnp.float32,
                            -1.0 / jnp.sqrt(H3), 1.0 / jnp.sqrt(H3))
    return (w1, b1, w2, b2, w3, b3, wc, bc)


def pack_slab(w2, w3, wc, b1, b2, b3, bc):
    """Pack conv2/conv3/classifier weights and all biases into one (32, HP) f32 slab."""
    slab = jnp.zeros((SLAB_ROWS, HP), jnp.float32)
    slab = slab.at[R_W2:R_W2 + H1, :H2].set(w2)
    slab = slab.at[R_W3:R_W3 + H2, :H3].set(w3)
    slab = slab.at[R_WC:R_WC + H3, :N_CLASSES].set(wc)
    slab = slab.at[R_B + 0, :H1].set(b1)
    slab = slab.at[R_B + 1, :H2].set(b2)
    slab = slab.at[R_B + 2, :H3].set(b3)
    slab = slab.at[R_B + 3, :N_CLASSES].set(bc)
    return slab


def gcn_reference(a_hat, x, params):
    """Pure-JAX reference mirroring the kernel's bf16 rounding points."""
    (w1, b1, w2, b2, w3, b3, wc, bc) = params
    bf, f32 = jnp.bfloat16, jnp.float32
    rnd = lambda m: m.astype(bf).astype(f32)
    a = rnd(a_hat)
    h = jnp.tanh(a @ rnd(rnd(x) @ rnd(w1)) + b1)
    h = jnp.tanh(a @ rnd(rnd(h) @ rnd(w2)) + b2)
    h = jnp.tanh(a @ rnd(rnd(h) @ rnd(w3)) + b3)
    out = rnd(h) @ rnd(wc) + bc
    return out, h


if __name__ == "__main__":
    key = jax.random.PRNGKey(0)
    k_graphs, k_feats, k_params = jax.random.split(key, 3)

    # TODO(synk): torch_geometric's KarateClub dataset is external data; a small batch of
    # synthetic random graphs over 34 nodes stands in for data.edge_index / data.x
    # (same per-graph shapes and forward semantics).
    B = 4
    num_edges = 80
    params = init_params(k_params)
    (w1, b1, w2, b2, w3, b3, wc, bc) = params

    # bf16 MXU operands (f32 accumulation inside the kernel) + packed f32 slab.
    w1_pad = pad2(w1, FEAT_P, HP, jnp.bfloat16)
    slab = pack_slab(w2, w3, wc, b1, b2, b3, bc)

    gk = jax.random.split(k_graphs, B)
    fk = jax.random.split(k_feats, B)
    a_hats, xs = [], []
    for i in range(B):
        edge_index = jax.random.randint(gk[i], (2, num_edges), 0, N_NODES, jnp.int32)
        a_hats.append(build_normalized_adjacency(edge_index, N_NODES))
        xs.append(0.5 * jax.random.normal(fk[i], (N_NODES, N_FEATS), jnp.float32))

    a_pad = jnp.stack([pad2(a, NV, NV, jnp.bfloat16) for a in a_hats])
    x_pad = jnp.stack([pad2(x, NV, FEAT_P, jnp.bfloat16) for x in xs])

    out, h = gcn_forward(a_pad, x_pad, w1_pad, slab)
    jax.block_until_ready((out, h))

    assert out.shape == (B, N_NODES, N_CLASSES), out.shape
    assert h.shape == (B, N_NODES, H3), h.shape

    # Correctness check against a pure-JAX reference (same bf16 rounding, f32 accumulation).
    for i in range(B):
        ref_out, ref_h = gcn_reference(a_hats[i], xs[i], params)
        assert jnp.allclose(out[i], ref_out, atol=1e-2, rtol=1e-2), \
            float(jnp.max(jnp.abs(out[i] - ref_out)))
        assert jnp.allclose(h[i], ref_h, atol=1e-2, rtol=1e-2), \
            float(jnp.max(jnp.abs(h[i] - ref_h)))

    print("KERNEL_OK")
</pallas_src>

<mosaic_0001>
module attributes {stable_mosaic.version = 11 : i64} {
  func.func @gcn_kernel(%arg0: i32, %arg1: memref<1x48x48xbf16, #tpu.memory_space<vmem>>, %arg2: memref<1x48x64xbf16, #tpu.memory_space<vmem>>, %arg3: memref<64x8xbf16, #tpu.memory_space<vmem>>, %arg4: memref<32x8xf32, #tpu.memory_space<vmem>>, %arg5: memref<1x2x48x8xf32, #tpu.memory_space<vmem>>) attributes {dimension_semantics = [#tpu.dimension_semantics<parallel>], iteration_bounds = array<i64: 4>, scalar_prefetch = 0 : i64, scratch_operands = 0 : i64, tpu.core_type = #tpu.core_type<tc>, window_params = [{transform_indices = @transform_0, window_bounds = array<i64: 1, 48, 48>}, {transform_indices = @transform_1, window_bounds = array<i64: 1, 48, 64>}, {pipeline_mode = #tpu.pipeline_mode<synchronous>, transform_indices = @transform_2, window_bounds = array<i64: 64, 8>}, {pipeline_mode = #tpu.pipeline_mode<synchronous>, transform_indices = @transform_3, window_bounds = array<i64: 32, 8>}, {transform_indices = @transform_4, window_bounds = array<i64: 1, 2, 48, 8>}]} {
    %c0 = arith.constant 0 : index
    %c0_0 = arith.constant 0 : index
    %c0_1 = arith.constant 0 : index
    %0 = vector.load %arg1[%c0, %c0_0, %c0_1] : memref<1x48x48xbf16, #tpu.memory_space<vmem>>, vector<1x48x48xbf16>
    %1 = vector.shape_cast %0 : vector<1x48x48xbf16> to vector<48x48xbf16>
    %c0_2 = arith.constant 0 : index
    %c0_3 = arith.constant 0 : index
    %2 = vector.load %arg4[%c0_2, %c0_3] : memref<32x8xf32, #tpu.memory_space<vmem>>, vector<32x8xf32>
    %3 = vector.extract_strided_slice %2 {offsets = [0, 0], sizes = [8, 8], strides = [1, 1]} : vector<32x8xf32> to vector<8x8xf32>
    %4 = arith.truncf %3 : vector<8x8xf32> to vector<8x8xbf16>
    %5 = vector.extract_strided_slice %2 {offsets = [8, 0], sizes = [8, 8], strides = [1, 1]} : vector<32x8xf32> to vector<8x8xf32>
    %6 = arith.truncf %5 : vector<8x8xf32> to vector<8x8xbf16>
    %7 = vector.extract_strided_slice %2 {offsets = [16, 0], sizes = [8, 8], strides = [1, 1]} : vector<32x8xf32> to vector<8x8xf32>
    %8 = arith.truncf %7 : vector<8x8xf32> to vector<8x8xbf16>
    %9 = vector.extract_strided_slice %2 {offsets = [24, 0], sizes = [1, 8], strides = [1, 1]} : vector<32x8xf32> to vector<1x8xf32>
    %10 = vector.extract_strided_slice %2 {offsets = [25, 0], sizes = [1, 8], strides = [1, 1]} : vector<32x8xf32> to vector<1x8xf32>
    %11 = vector.extract_strided_slice %2 {offsets = [26, 0], sizes = [1, 8], strides = [1, 1]} : vector<32x8xf32> to vector<1x8xf32>
    %12 = vector.extract_strided_slice %2 {offsets = [27, 0], sizes = [1, 8], strides = [1, 1]} : vector<32x8xf32> to vector<1x8xf32>
    %13 = tpu.iota {dimensions = array<i32: 0>} : vector<48x8xi32>
    %c34_i32 = arith.constant 34 : i32
    %14 = vector.broadcast %c34_i32 : i32 to vector<48x8xi32>
    %15 = arith.cmpi slt, %13, %14 : vector<48x8xi32>
    %16 = arith.extui %15 : vector<48x8xi1> to vector<48x8xi32>
    %17 = arith.sitofp %16 : vector<48x8xi32> to vector<48x8xf32>
    %c0_4 = arith.constant 0 : index
    %c0_5 = arith.constant 0 : index
    %c0_6 = arith.constant 0 : index
    %18 = vector.load %arg2[%c0_4, %c0_5, %c0_6] : memref<1x48x64xbf16, #tpu.memory_space<vmem>>, vector<1x48x64xbf16>
    %19 = vector.shape_cast %18 : vector<1x48x64xbf16> to vector<48x64xbf16>
    %c0_7 = arith.constant 0 : index
    %c0_8 = arith.constant 0 : index
    %20 = vector.load %arg3[%c0_7, %c0_8] : memref<64x8xbf16, #tpu.memory_space<vmem>>, vector<64x8xbf16>
    %cst = arith.constant dense<0.000000e+00> : vector<48x8xf32>
    %21 = tpu.matmul %19, %20, %cst {dimension_numbers = #tpu.dot_dimension_numbers<[1], [0], [0], [1], [0, 0, 1, 1], [], []>} : vector<48x64xbf16>, vector<64x8xbf16>, vector<48x8xf32> -> vector<48x8xf32>
    %22 = arith.truncf %21 : vector<48x8xf32> to vector<48x8xbf16>
    %cst_9 = arith.constant dense<0.000000e+00> : vector<48x8xf32>
    %23 = tpu.matmul %1, %22, %cst_9 {dimension_numbers = #tpu.dot_dimension_numbers<[1], [0], [0], [1], [0, 0, 1, 1], [], []>} : vector<48x48xbf16>, vector<48x8xbf16>, vector<48x8xf32> -> vector<48x8xf32>
    %24 = vector.broadcast %9 : vector<1x8xf32> to vector<48x8xf32>
    %25 = arith.mulf %17, %24 : vector<48x8xf32>
    %26 = arith.addf %23, %25 : vector<48x8xf32>
    %27 = math.tanh %26 : vector<48x8xf32>
    %28 = arith.truncf %27 : vector<48x8xf32> to vector<48x8xbf16>
    %cst_10 = arith.constant dense<0.000000e+00> : vector<48x8xf32>
    %29 = tpu.matmul %28, %4, %cst_10 {dimension_numbers = #tpu.dot_dimension_numbers<[1], [0], [0], [1], [0, 0, 1, 1], [], []>} : vector<48x8xbf16>, vector<8x8xbf16>, vector<48x8xf32> -> vector<48x8xf32>
    %30 = arith.truncf %29 : vector<48x8xf32> to vector<48x8xbf16>
    %cst_11 = arith.constant dense<0.000000e+00> : vector<48x8xf32>
    %31 = tpu.matmul %1, %30, %cst_11 {dimension_numbers = #tpu.dot_dimension_numbers<[1], [0], [0], [1], [0, 0, 1, 1], [], []>} : vector<48x48xbf16>, vector<48x8xbf16>, vector<48x8xf32> -> vector<48x8xf32>
    %32 = vector.broadcast %10 : vector<1x8xf32> to vector<48x8xf32>
    %33 = arith.mulf %17, %32 : vector<48x8xf32>
    %34 = arith.addf %31, %33 : vector<48x8xf32>
    %35 = math.tanh %34 : vector<48x8xf32>
    %36 = arith.truncf %35 : vector<48x8xf32> to vector<48x8xbf16>
    %cst_12 = arith.constant dense<0.000000e+00> : vector<48x8xf32>
    %37 = tpu.matmul %36, %6, %cst_12 {dimension_numbers = #tpu.dot_dimension_numbers<[1], [0], [0], [1], [0, 0, 1, 1], [], []>} : vector<48x8xbf16>, vector<8x8xbf16>, vector<48x8xf32> -> vector<48x8xf32>
    %38 = arith.truncf %37 : vector<48x8xf32> to vector<48x8xbf16>
    %cst_13 = arith.constant dense<0.000000e+00> : vector<48x8xf32>
    %39 = tpu.matmul %1, %38, %cst_13 {dimension_numbers = #tpu.dot_dimension_numbers<[1], [0], [0], [1], [0, 0, 1, 1], [], []>} : vector<48x48xbf16>, vector<48x8xbf16>, vector<48x8xf32> -> vector<48x8xf32>
    %40 = vector.broadcast %11 : vector<1x8xf32> to vector<48x8xf32>
    %41 = arith.mulf %17, %40 : vector<48x8xf32>
    %42 = arith.addf %39, %41 : vector<48x8xf32>
    %43 = math.tanh %42 : vector<48x8xf32>
    %44 = arith.truncf %43 : vector<48x8xf32> to vector<48x8xbf16>
    %cst_14 = arith.constant dense<0.000000e+00> : vector<48x8xf32>
    %45 = tpu.matmul %44, %8, %cst_14 {dimension_numbers = #tpu.dot_dimension_numbers<[1], [0], [0], [1], [0, 0, 1, 1], [], []>} : vector<48x8xbf16>, vector<8x8xbf16>, vector<48x8xf32> -> vector<48x8xf32>
    %46 = vector.broadcast %12 : vector<1x8xf32> to vector<48x8xf32>
    %47 = arith.mulf %17, %46 : vector<48x8xf32>
    %48 = arith.addf %45, %47 : vector<48x8xf32>
    %c0_15 = arith.constant 0 : index
    %c0_16 = arith.constant 0 : index
    %c0_17 = arith.constant 0 : index
    %c0_18 = arith.constant 0 : index
    %49 = vector.load %arg5[%c0_15, %c0_16, %c0_17, %c0_18] : memref<1x2x48x8xf32, #tpu.memory_space<vmem>>, vector<1x1x48x8xf32>
    %50 = vector.shape_cast %49 : vector<1x1x48x8xf32> to vector<48x8xf32>
    %51 = vector.shape_cast %48 : vector<48x8xf32> to vector<1x1x48x8xf32>
    tpu.vector_store %arg5[%c0_15, %c0_16, %c0_17, %c0_18], %51 {strides = array<i32>} : memref<1x2x48x8xf32, #tpu.memory_space<vmem>>, vector<1x1x48x8xf32>,
    %c0_19 = arith.constant 0 : index
    %c1 = arith.constant 1 : index
    %c0_20 = arith.constant 0 : index
    %c0_21 = arith.constant 0 : index
    %52 = vector.load %arg5[%c0_19, %c1, %c0_20, %c0_21] : memref<1x2x48x8xf32, #tpu.memory_space<vmem>>, vector<1x1x48x8xf32>
    %53 = vector.shape_cast %52 : vector<1x1x48x8xf32> to vector<48x8xf32>
    %54 = vector.shape_cast %43 : vector<48x8xf32> to vector<1x1x48x8xf32>
    tpu.vector_store %arg5[%c0_19, %c1, %c0_20, %c0_21], %54 {strides = array<i32>} : memref<1x2x48x8xf32, #tpu.memory_space<vmem>>, vector<1x1x48x8xf32>,
    return
  }
  func.func @transform_0(%arg0: i32) -> (i32, i32, i32) {
    %c0_i32 = arith.constant 0 : i32
    %c0_i32_0 = arith.constant 0 : i32
    %c0_i32_1 = arith.constant 0 : i32
    return %arg0, %c0_i32, %c0_i32_0 : i32, i32, i32
  }
  func.func @transform_1(%arg0: i32) -> (i32, i32, i32) {
    %c0_i32 = arith.constant 0 : i32
    %c0_i32_0 = arith.constant 0 : i32
    %c0_i32_1 = arith.constant 0 : i32
    return %arg0, %c0_i32, %c0_i32_0 : i32, i32, i32
  }
  func.func @transform_2(%arg0: i32) -> (i32, i32) {
    %c0_i32 = arith.constant 0 : i32
    %c0_i32_0 = arith.constant 0 : i32
    %c0_i32_1 = arith.constant 0 : i32
    return %c0_i32, %c0_i32_0 : i32, i32
  }
  func.func @transform_3(%arg0: i32) -> (i32, i32) {
    %c0_i32 = arith.constant 0 : i32
    %c0_i32_0 = arith.constant 0 : i32
    %c0_i32_1 = arith.constant 0 : i32
    return %c0_i32, %c0_i32_0 : i32, i32
  }
  func.func @transform_4(%arg0: i32) -> (i32, i32, i32, i32) {
    %c0_i32 = arith.constant 0 : i32
    %c0_i32_0 = arith.constant 0 : i32
    %c0_i32_1 = arith.constant 0 : i32
    %c0_i32_2 = arith.constant 0 : i32
    return %arg0, %c0_i32, %c0_i32_0, %c0_i32_1 : i32, i32, i32, i32
  }
}

</mosaic_0001>

<bundles_post_ra>
// kernel: gcn_forward.1
= control target key start
LH: loop header
LB: loop body
LE: loop exit
PB: predicated region body
PF: predicated region fallthrough
CT: control target
= control target key end

     0   :  { %9 = vsyncpa [#allocation3], 0  ;;  %s1772_s0 = inlined_call_operand.hbm [shape: bf16[4,48,48], index: 0, kind: input, shape index: {}]   ;;  %s1773_s1 = inlined_call_operand.hbm [shape: bf16[4,48,64], index: 1, kind: input, shape index: {}]   ;;  %s1774_s2 = inlined_call_operand.vmem [shape: bf16[64,8], index: 2, kind: input, shape index: {}]   ;;  %s1775_s3 = inlined_call_operand.vmem [shape: f32[32,8], index: 3, kind: input, shape index: {}]   ;;  %s1776_s4 = inlined_call_operand.vmem [shape: f32[4,2,48,8], index: 4, kind: output, shape index: {}]  }
   0x1   :  { %11 = vsyncpa [#allocation3 + $0x1], 0 }
   0x2   :  { %12 = vsyncpa [#allocation5], 0 }
   0x3   :  { %14 = vsyncpa [#allocation5 + $0x1], 0  ;;  %s1434_s15 = smov 0   ;;  %s1436_s16 = smov 0  }
   0x4   :  { %s1438_s17 = smov 0   ;;  %s1440_s18 = smov 0  }
   0x5 LB: > { %s1453_s19 = sadd.s32 4294967295, %s1401_s18   ;;  %s1456_s20 = sadd.s32 1, %s1401_s18   ;;  %s1401_s18 = sphi %s1440_s18, %s1786_s18   ;;  %s1397_s17 = sphi %s1438_s17, %s1785_s17   ;;  %s1393_s16 = sphi %s1436_s16, %s1784_s16   ;;  %s1389_s15 = sphi %s1434_s15, %s1783_s15  }
   0x6   : > { %s24_s21 = ssub.s32 %s1401_s18, %s1456_s20  ;;  %s27_s22 = sadd.s32 1, %s1397_s17 }
   0x7   : > { %p25_p0 = scmp.eq.s32.totalorder %s24_s21, 0  ;;  %p34_p1 = scmp.ne.s32.totalorder %s1397_s17, %s1393_s16 }
   0x8   : > { %p35_p2 = scmp.eq.s32.totalorder %s1401_s18, 0  ;;  %p40_p3 = scmp.ne.s32.totalorder %s1393_s16, %s1389_s15 }
   0x9   : > { %s1466_s23 = scalar_select %p25_p0, %s1397_s17, %s27_s22  }
   0xa   : > { %p36_p4 = por %p35_p2, %p34_p1  ;;  %p41_p5 = scmp.eq.s32.totalorder %s1453_s19, 0 }
   0xb   : > { %p1220_p6 = scmp.lt.s32.totalorder %s1401_s18, 4  ;;  %s1475_s25 = sand.u32 1, %s1397_s17  }
   0xc   : > { %p1470_p7 = por %p41_p5, %p40_p3  ;;  %s1203_s26 = smul.u32 24, %s1475_s25 }
   0xd   : > { %s1204_s27 = smul.u32 384, %s1401_s18  ;;  %p1479_p8 = pnand %p1220_p6, %p36_p4 }
   0xe   : > { %s1778_s24 = scalar_select %p1470_p7, 1, 0 }
   0xf   : > { %s1488_s5 = scalar_lea.hbm %s1772_s0, %s1204_s27  ;;  %s168_s6 = scalar_lea.vmem [#allocation2], %s1203_s26 }
  0x10   : > { %s175_s7 = sshll.u32 %s168_s6, 4  ;;  %s165_s8 = scalar_lea.sflag [#allocation3], %s1475_s25  ;;  %s1492_s7 = int_to_ptr.vmem [resolvable:$true] %s175_s7 }
  0x11   : > { %s1303_s9 = scalar_lea.hbm %s1488_s5, 384  ;;  %p1305_p11 = pneg %p1479_p8 }
  0x12   : > { %p1304_p10 = scmp.ne.s32.totalorder %s1488_s5, %s1303_s9  ;;  %s1308_s12 = scalar_lea.hbm %s1772_s0, 1536 }
  0x13   : > { %p1309_p0 = scmp.lt.u32.totalorder %s1488_s5, %s1772_s0  ;;  %p1310_p1 = scmp.lt.u32.totalorder %s1308_s12, %s1303_s9 }
  0x14   : > { %p1306_p12 = pnand %p1305_p11, %p1304_p10  ;;  %p1312_p3 = scmp.lt.u32.totalorder %s1303_s9, %s1488_s5 }
  0x15   : > { %p1311_p2 = por %p1310_p1, %p1309_p0 }
  0x16   : > { %p1307_p13 = pneg %p1306_p12 }
  0x17   : > { %p1313_p4 = por %p1312_p3, %p1311_p2 }
  0x19   : > { %p1314_p5 = pnand %p1313_p4, %p1307_p13 }
  0x1b   : > { %1317 = shalt.err (!%p1314_p5)
}
  0x1c   : > { %s1318_s15 = scalar_lea.vmem %s1492_s7, 384  ;;  %s1403_s21 = smov [#allocation2]  }
  0x1d   : > { %p1319_p6 = scmp.ne.s32.totalorder %s1492_s7, %s1318_s15  ;;  %s1323_s22 = sshll.u32 %s1403_s21, 4  ;;  %s1324_s22 = int_to_ptr.vmem [resolvable:$false] %s1323_s22 }
  0x1e   : > { %s1325_s29 = scalar_lea.vmem %s1324_s22, 768  ;;  %p1326_p9 = scmp.lt.s32.totalorder %s1492_s7, %s1324_s22 }
  0x1f   : > { %p1321_p10 = pnand %p1319_p6, %p1305_p11  ;;  %p1327_p0 = scmp.lt.s32.totalorder %s1325_s29, %s1318_s15 }
  0x21   : > { %p1322_p12 = pneg %p1321_p10  ;;  %p1328_p1 = por %p1327_p0, %p1326_p9 }
  0x23   : > { %p1329_p2 = pnand %p1328_p1, %p1322_p12 }
  0x25   : > { %1332 = shalt.err (!%p1329_p2)
}
  0x26   : > { %s1404_s30 = smov 64   ;;  %s1405_s6 = smov 4  }
  0x27   : > { %1216 = dma.hbm_to_vmem [thread:$0]  (!%p1479_p8), %s1488_s5, 384, %s1492_s7, %s165_s8, %s1404_s30, %s1404_s30, %s1405_s6  }
  0x28   : > { %p204_p9 = scmp.lt.s32.totalorder %s1401_s18, 5  ;;  %s1532_s11 = scalar_lea.hbm %s1773_s1, %s1204_s27 }
  0x29   : > { %p1780_p13 = scmp.ge.s32.totalorder %s1401_s18, 1  ;;  %s189_s13 = scalar_lea.vmem [#allocation4], %s1203_s26 }
  0x2a   : > { %s196_s14 = sshll.u32 %s189_s13, 4  ;;  %s186_s5 = scalar_lea.sflag [#allocation5], %s1475_s25  ;;  %s1542_s14 = int_to_ptr.vmem [resolvable:$true] %s196_s14 }
  0x2b   : > { %p1536_p3 = pnand %p1780_p13, %p204_p9  ;;  %s1333_s7 = scalar_lea.hbm %s1532_s11, 384 }
  0x2c   : > { %p1334_p4 = scmp.ne.s32.totalorder %s1532_s11, %s1333_s7  ;;  %s1338_s8 = scalar_lea.hbm %s1773_s1, 1536 }
  0x2d   : > { %p1339_p10 = scmp.lt.u32.totalorder %s1532_s11, %s1773_s1  ;;  %p1340_p12 = scmp.lt.u32.totalorder %s1338_s8, %s1333_s7 }
  0x2e   : > { %p1336_p5 = pnand %p1334_p4, %p1305_p11  ;;  %p1342_p1 = scmp.lt.u32.totalorder %s1333_s7, %s1532_s11 }
  0x2f   : > { %p1341_p0 = por %p1340_p12, %p1339_p10 }
  0x30   : > { %p1337_p6 = pneg %p1336_p5 }
  0x31   : > { %p1343_p2 = por %p1342_p1, %p1341_p0 }
  0x33   : > { %p1344_p9 = pnand %p1343_p2, %p1337_p6 }
  0x35   : > { %1347 = shalt.err (!%p1344_p9)
}
  0x36   : > { %s1348_s26 = scalar_lea.vmem %s1542_s14, 384  ;;  %s1406_s22 = smov [#allocation4]  }
  0x37   : > { %p1349_p13 = scmp.ne.s32.totalorder %s1542_s14, %s1348_s26  ;;  %s1353_s29 = sshll.u32 %s1406_s22, 4  ;;  %s1354_s29 = int_to_ptr.vmem [resolvable:$false] %s1353_s29 }
  0x38   : > { %s1355_s9 = scalar_lea.vmem %s1354_s29, 768  ;;  %p1356_p7 = scmp.lt.s32.totalorder %s1542_s14, %s1354_s29 }
  0x39   : > { %p1351_p4 = pnand %p1349_p13, %p1305_p11  ;;  %p1357_p10 = scmp.lt.s32.totalorder %s1355_s9, %s1348_s26 }
  0x3b   : > { %p1352_p5 = pneg %p1351_p4  ;;  %p1358_p12 = por %p1357_p10, %p1356_p7 }
  0x3d   : > { %p1359_p0 = pnand %p1358_p12, %p1352_p5 }
  0x3f   : > { %1362 = shalt.err (!%p1359_p0)
}
  0x40   : > { %1219 = dma.hbm_to_vmem [thread:$0]  (!%p1479_p8), %s1532_s11, 384, %s1542_s14, %s186_s5, %s1404_s30, %s1404_s30, %s1405_s6  }
  0x41   : > { %208 = sbr.rel (%p1536_p3) target bundleno = 1718 (0x6b6), region = 36  ;;  %s210_s10 = sand.u32 (!%p1536_p3), 1, %s1393_s16  }
  0x42   : > { %s1207_s13 = smul.u32 (!%p1536_p3), 24, %s210_s10  ;;  %s211_s7 = scalar_lea.sflag (!%p1536_p3), [#allocation3], %s210_s10 }
  0x43   : > { %p1782_p7 = scmp.ne.s32.totalorder (!%p1536_p3), %s1778_s24, 0 }
  0x44   : > { %s1576_s18 = scalar_lea.vmem (!%p1536_p3), [#allocation2], %s1207_s13 }
  0x48   : > { %1380 = dma.done.wait (%p1782_p7), %s211_s7, 384  }
  0x49   : > { %1382 = vsyncadd (%p1782_p7), %s211_s7, 4294966912  ;;  %s220_s25 = scalar_lea.sflag [#allocation5], %s210_s10  ;;  %s223_s28 = scalar_lea.vmem [#allocation4], %s1207_s13 }
  0x4a   : > { %1384 = dma.done.wait (%p1782_p7), %s220_s25, 384  }
  0x4b   : > { %1386 = vsyncadd (%p1782_p7), %s220_s25, 4294966912  ;;  %v1407_v0 = vmov 0.0   ;;  %vm1408_vm0 = vmmov 0   ;;  %v1257_v1 = vld [vmem:[%s1774_s2] sm:$0xff]   ;;  %v1258_v2 = vld [vmem:[%s1774_s2 + $0x8] sm:$0xff]   ;;  %vm350_vm1 = vcmask 523264   ;;  %v272_v29 = vlaneseq }
  0x4c   : > { %1085 = vmatprep.subr.bf16.mxu0 %v1407_v0  ;;  %1093 = vmatprep.mubr.msk.bf16.mxu0 %vm1408_vm0, %v1407_v0  ;;  %v1259_v3 = vld [vmem:[%s1774_s2 + $0x10] sm:$0xff]   ;;  %v1260_v4 = vld [vmem:[%s1774_s2 + $0x18] sm:$0xff]   ;;  %v265_v18 = vld [vmem:[%s1775_s3] sm:$0xff]  ;;  %vm531_vm2 = vcmask 1043456   ;;  %vm445_vm3 = vcmask 392192   ;;  %vm521_vm5 = vcmask 64512  }
  0x4d   : > { %1105 = vmatprep.subr.bf16.mxu1 %v1407_v0  ;;  %1111 = vmatprep.mubr.msk.bf16.mxu1 %vm1408_vm0, %v1407_v0  ;;  %v1261_v5 = vld [vmem:[%s223_s28] sm:$0xff]   ;;  %v1262_v6 = vld [vmem:[%s223_s28 + $0x8] sm:$0xff]   ;;  %v1263_v7 = vld [vmem:[%s223_s28 + $0x10] sm:$0xff]   ;;  %v269_v22 = vpack.c.bf16 %v265_v18, %v265_v18  ;;  %v1643_v30 = vshrl.u32 %v272_v29, 7  ;;  %p253_p8 = scmp.lt.s32.totalorder %s1453_s19, 3 }
  0x4e   : > { %1086 = vmatpush3.bf16.msra.mxu0 %v1257_v1  ;;  %v1620_v25 = vld [vmem:[%s1576_s18] sm:$0xff]   ;;  %v1630_v27 = vld [vmem:[%s1576_s18 + $0x8] sm:$0xff]   ;;  %v1637_v28 = vld [vmem:[%s1576_s18 + $0x10] sm:$0xff]  }
  0x4f   : > { %1087 = vmatprep.subr.bf16.mxu0 %v1407_v0  ;;  %v533_v26 = vsel %vm531_vm2, %v269_v22, 0  ;;  %v422_v31 = vsub.s32 0, %v1643_v30  ;;  %v1649_v32 = vld [vmem:[%s1775_s3 + $0x18] sm:$0xff]  ;;  %v277_v40 = vadd.s32 32, %v1643_v30  ;;  %s1788_s19 = smov (!%p253_p8, %s1453_s19), 3 }
  0x50   : > { %s1208_s13 = smul.u32 96, %s1788_s19 }
  0x51   : > { %v423_v33 = vrot.slane %v1649_v32, %v422_v31  ;;  %vm283_vm4 = vcmp.lt.s32.totalorder %v277_v40, 34 }
  0x52   : > { %1088 = vmatpush3.bf16.msra.mxu0 %v1258_v2  ;;  %v1654_v45 = vsel %vm283_vm4, 1.0, %v1407_v0  ;;  %v266_v2 = vld [vmem:[%s1775_s3 + $0x8] sm:$0xff]  ;;  %s1724_s25 = scalar_lea.vmem %s1776_s4, %s1208_s13 }
  0x53   : > { %1089 = vmatprep.subr.bf16.mxu0 %v1407_v0  ;;  %v428_v48 = vmul.f32 %v1654_v45, %v423_v33  ;;  %v429_v51 = vmul.f32 0.0, %v423_v33 }
  0x56   : > { %1090 = vmatpush3.bf16.msra.mxu0 %v1259_v3  ;;  %v270_v3 = vpack.c.bf16 %v266_v2, %v266_v2 }
  0x57   : > { %1091 = vmatprep.subr.bf16.mxu0 %v1407_v0 }
  0x5a   : > { %1092 = vmatpush3.bf16.msra.mxu0 %v1260_v4  ;;  %v681_v4 = vsel %vm531_vm2, %v270_v3, 0 }
  0x5b   : > { %1137 = vmatprep.subr.bf16.mxu0 %v1407_v0 }
  0x5d   : > { %1094 = vmatmul.mubr.msk.bf16.vlgmr.msra.gmra.mrb[0].mxu0 %vm350_vm1, %v1261_v5 }
  0x5e   : > { %1097 = vmatprep.mubr.msk.bf16.mxu0 %vm1408_vm0, %v1407_v0 }
  0x65   : > { %1098 = vmatmul.mubr.msk.bf16.gmra.mrb[4].mxu0 %vm350_vm1, %v1262_v6 }
  0x66   : > { %1101 = vmatprep.mubr.msk.bf16.mxu0 %vm1408_vm0, %v1407_v0 }
  0x6d   : > { %1102 = vmatmul.mubr.msk.bf16.gmra.mrb[8].mxu0 %vm350_vm1, %v1263_v7 }
  0x6e   : > { %1143 = vmatprep.mubr.msk.bf16.mxu0 %vm1408_vm0, %v1407_v0 }
 0x130   : > { %v394_v8 = vpop.f32.mrb[0].mxu0 }
 0x131   : > { %v1095_v9 = vpop.f32.mrb[1].mxu0 }
 0x132   : > { %v397_v10 = vpop.f32.mrb[2].mxu0 }
 0x133   : > { %v417_v11 = vpack.c.bf16 %v397_v10, %v394_v8  ;;  %v1096_v12 = vpop.f32.mrb[3].mxu0 }
 0x135   : > { %1106 = vmatpush3.bf16.msra.mxu1 %v417_v11 }
 0x136   : > { %1107 = vmatprep.subr.bf16.mxu1 %v1407_v0 }
 0x138   : > { %v402_v13 = vpop.f32.mrb[4].mxu0 }
 0x139   : > { %v1099_v14 = vpop.f32.mrb[5].mxu0 }
 0x13a   : > { %v405_v15 = vpop.f32.mrb[6].mxu0 }
 0x13b   : > { %v418_v16 = vpack.c.bf16 %v405_v15, %v402_v13  ;;  %v1100_v17 = vpop.f32.mrb[7].mxu0 }
 0x13d   : > { %1108 = vmatpush3.bf16.msra.mxu1 %v418_v16 }
 0x13e   : > { %1109 = vmatprep.subr.bf16.mxu1 %v1407_v0 }
 0x140   : > { %v410_v19 = vpop.f32.mrb[8].mxu0 }
 0x141   : > { %v1103_v20 = vpop.f32.mrb[9].mxu0 }
 0x142   : > { %v413_v21 = vpop.f32.mrb[10].mxu0  ;;  %v597_v20 = vsub.s32 1, %v1643_v30 }
 0x143   : > { %v419_v23 = vpack.c.bf16 %v413_v21, %v410_v19  ;;  %v1104_v24 = vpop.f32.mrb[11].mxu0 }
 0x144   : > { %v598_v21 = vrot.slane %v1649_v32, %v597_v20 }
 0x145   : > { %1110 = vmatpush3.bf16.msra.mxu1 %v419_v23 }
 0x146   : > { %1123 = vmatprep.subr.bf16.mxu1 %v1407_v0 }
 0x148   : > { %1112 = vmatmul.mubr.msk.bf16.vlgmr.msra.gmra.mrb[0].mxu1 %vm445_vm3, %v1620_v25 }
 0x149   : > { %1115 = vmatprep.mubr.msk.bf16.mxu1 %vm1408_vm0, %v1407_v0  ;;  %1124 = vmatpush3.bf16.msra.mxu1 %v533_v26 }
 0x14a   : > { %1155 = vmatprep.subr.bf16.mxu1 %v1407_v0 }
 0x150   : > { %1116 = vmatmul.mubr.msk.bf16.gmra.mrb[4].mxu1 %vm445_vm3, %v1630_v27 }
 0x151   : > { %1119 = vmatprep.mubr.msk.bf16.mxu1 %vm1408_vm0, %v1407_v0 }
 0x158   : > { %1120 = vmatmul.mubr.msk.bf16.gmra.mrb[8].mxu1 %vm445_vm3, %v1637_v28 }
 0x159   : > { %1125 = vmatprep.mubr.msk.bf16.mxu1 %vm1408_vm0, %v1407_v0 }
 0x21b   : > { %v489_v34 = vpop.f32.mrb[0].mxu1 }
 0x21c   : > { %v490_v35 = vadd.f32 %v489_v34, %v423_v33  ;;  %v1113_v36 = vpop.f32.mrb[1].mxu1 }
 0x21d   : > { %v492_v37 = vpop.f32.mrb[2].mxu1 }
 0x21e   : > { %v493_v38 = vadd.f32 %v492_v37, %v423_v33  ;;  %v1114_v39 = vpop.f32.mrb[3].mxu1  ;;  %1267 = vtanh.f32 %v490_v35 }
 0x21f   : > { %v603_v39 = vmul.f32 %v1654_v45, %v598_v21 }
 0x220   : > { %1269 = vtanh.f32 %v493_v38 }
 0x223   : > { %v497_v41 = vpop.f32.mrb[4].mxu1 }
 0x224   : > { %v498_v42 = vadd.f32 %v497_v41, %v423_v33  ;;  %v1117_v43 = vpop.f32.mrb[5].mxu1 }
 0x225   : > { %v500_v44 = vpop.f32.mrb[6].mxu1 }
 0x226   : > { %v501_v46 = vadd.f32 %v500_v44, %v423_v33  ;;  %v1118_v47 = vpop.f32.mrb[7].mxu1  ;;  %1271 = vtanh.f32 %v498_v42  ;;  %v604_v42 = vmul.f32 0.0, %v598_v21 }
 0x228   : > { %1273 = vtanh.f32 %v501_v46  ;;  %v1268_v49 = vpop.eup %1267 }
 0x22a   : > { %v1270_v50 = vpop.eup %1269 }
 0x22b   : > { %v518_v52 = vpack.c.bf16 %v1270_v50, %v1268_v49  ;;  %v505_v53 = vpop.f32.mrb[8].mxu1 }
 0x22c   : > { %v506_v54 = vadd.f32 %v505_v53, %v428_v48  ;;  %v1121_v55 = vpop.f32.mrb[9].mxu1 }
 0x22d   : > { %v508_v56 = vpop.f32.mrb[10].mxu1  ;;  %1126 = vmatmul.mubr.msk.bf16.vlgmr.msra.gmra.mrb[12].mxu1 %vm521_vm5, %v518_v52 }
 0x22e   : > { %v509_v57 = vadd.f32 %v508_v56, %v429_v51  ;;  %v1122_v58 = vpop.f32.mrb[11].mxu1  ;;  %1129 = vmatprep.mubr.msk.bf16.mxu1 %vm1408_vm0, %v1407_v0  ;;  %1275 = vtanh.f32 %v506_v54  ;;  %1156 = vmatpush3.bf16.msra.mxu1 %v681_v4 }
 0x22f   : > { %1201 = vmatprep.subr.bf16.mxu1 %v1407_v0 }
 0x230   : > { %1277 = vtanh.f32 %v509_v57  ;;  %v1272_v59 = vpop.eup %1271 }
 0x232   : > { %v1274_v60 = vpop.eup %1273 }
 0x233   : > { %v519_v61 = vpack.c.bf16 %v1274_v60, %v1272_v59 }
 0x235   : > { %1130 = vmatmul.mubr.msk.bf16.gmra.mrb[16].mxu1 %vm521_vm5, %v519_v61 }
 0x236   : > { %1133 = vmatprep.mubr.msk.bf16.mxu1 %vm1408_vm0, %v1407_v0 }
 0x238   : > { %v1276_v62 = vpop.eup %1275 }
 0x23a   : > { %v1278_v63 = vpop.eup %1277 }
 0x23b   : > { %v520_v1 = vpack.c.bf16 %v1278_v63, %v1276_v62 }
 0x23d   : > { %1134 = vmatmul.mubr.msk.bf16.gmra.mrb[20].mxu1 %vm521_vm5, %v520_v1 }
 0x23e   : > { %1157 = vmatprep.mubr.msk.bf16.mxu1 %vm1408_vm0, %v1407_v0 }
 0x300   : > { %v569_v5 = vpop.f32.mrb[12].mxu1 }
 0x301   : > { %v1127_v6 = vpop.f32.mrb[13].mxu1 }
 0x302   : > { %v572_v7 = vpop.f32.mrb[14].mxu1 }
 0x303   : > { %v592_v8 = vpack.c.bf16 %v572_v7, %v569_v5  ;;  %v1128_v9 = vpop.f32.mrb[15].mxu1 }
 0x305   : > { %1138 = vmatpush3.bf16.msra.mxu0 %v592_v8 }
 0x306   : > { %1139 = vmatprep.subr.bf16.mxu0 %v1407_v0 }
 0x308   : > { %v577_v10 = vpop.f32.mrb[16].mxu1 }
 0x309   : > { %v1131_v11 = vpop.f32.mrb[17].mxu1 }
 0x30a   : > { %v580_v12 = vpop.f32.mrb[18].mxu1 }
 0x30b   : > { %v593_v13 = vpack.c.bf16 %v580_v12, %v577_v10  ;;  %v1132_v14 = vpop.f32.mrb[19].mxu1 }
 0x30d   : > { %1140 = vmatpush3.bf16.msra.mxu0 %v593_v13 }
 0x30e   : > { %1141 = vmatprep.subr.bf16.mxu0 %v1407_v0 }
 0x310   : > { %v585_v15 = vpop.f32.mrb[20].mxu1 }
 0x311   : > { %v1135_v16 = vpop.f32.mrb[21].mxu1 }
 0x312   : > { %v588_v17 = vpop.f32.mrb[22].mxu1 }
 0x313   : > { %v594_v18 = vpack.c.bf16 %v588_v17, %v585_v15  ;;  %v1136_v19 = vpop.f32.mrb[23].mxu1 }
 0x315   : > { %1142 = vmatpush3.bf16.msra.mxu0 %v594_v18 }
 0x316   : > { %1169 = vmatprep.subr.bf16.mxu0 %v1407_v0 }
 0x318   : > { %1144 = vmatmul.mubr.msk.bf16.vlgmr.msra.gmra.mrb[12].mxu0 %vm445_vm3, %v1620_v25 }
 0x319   : > { %1147 = vmatprep.mubr.msk.bf16.mxu0 %vm1408_vm0, %v1407_v0 }
 0x320   : > { %1148 = vmatmul.mubr.msk.bf16.gmra.mrb[16].mxu0 %vm445_vm3, %v1630_v27 }
 0x321   : > { %1151 = vmatprep.mubr.msk.bf16.mxu0 %vm1408_vm0, %v1407_v0 }
 0x328   : > { %1152 = vmatmul.mubr.msk.bf16.gmra.mrb[20].mxu0 %vm445_vm3, %v1637_v28 }
 0x329   : > { %1175 = vmatprep.mubr.msk.bf16.mxu0 %vm1408_vm0, %v1407_v0 }
 0x3eb   : > { %v639_v22 = vpop.f32.mrb[12].mxu0 }
 0x3ec   : > { %v640_v23 = vadd.f32 %v639_v22, %v598_v21  ;;  %v1145_v24 = vpop.f32.mrb[13].mxu0 }
 0x3ed   : > { %v642_v26 = vpop.f32.mrb[14].mxu0 }
 0x3ee   : > { %v643_v29 = vadd.f32 %v642_v26, %v598_v21  ;;  %v1146_v31 = vpop.f32.mrb[15].mxu0  ;;  %1279 = vtanh.f32 %v640_v23 }
 0x3f0   : > { %1281 = vtanh.f32 %v643_v29 }
 0x3f3   : > { %v647_v33 = vpop.f32.mrb[16].mxu0 }
 0x3f4   : > { %v648_v34 = vadd.f32 %v647_v33, %v598_v21  ;;  %v1149_v35 = vpop.f32.mrb[17].mxu0 }
 0x3f5   : > { %v650_v36 = vpop.f32.mrb[18].mxu0 }
 0x3f6   : > { %v651_v37 = vadd.f32 %v650_v36, %v598_v21  ;;  %v1150_v38 = vpop.f32.mrb[19].mxu0  ;;  %1283 = vtanh.f32 %v648_v34 }
 0x3f8   : > { %1285 = vtanh.f32 %v651_v37  ;;  %v1280_v40 = vpop.eup %1279 }
 0x3fa   : > { %v1282_v41 = vpop.eup %1281 }
 0x3fb   : > { %v668_v43 = vpack.c.bf16 %v1282_v41, %v1280_v40  ;;  %v655_v44 = vpop.f32.mrb[20].mxu0 }
 0x3fc   : > { %v656_v46 = vadd.f32 %v655_v44, %v603_v39  ;;  %v1153_v47 = vpop.f32.mrb[21].mxu0 }
 0x3fd   : > { %v658_v48 = vpop.f32.mrb[22].mxu0  ;;  %1158 = vmatmul.mubr.msk.bf16.vlgmr.msra.gmra.mrb[24].mxu1 %vm521_vm5, %v668_v43 }
 0x3fe   : > { %v659_v49 = vadd.f32 %v658_v48, %v604_v42  ;;  %v1154_v50 = vpop.f32.mrb[23].mxu0  ;;  %1161 = vmatprep.mubr.msk.bf16.mxu1 %vm1408_vm0, %v1407_v0  ;;  %1287 = vtanh.f32 %v656_v46  ;;  %v821_v46 = vsub.s32 3, %v1643_v30 }
 0x400   : > { %1289 = vtanh.f32 %v659_v49  ;;  %v1284_v51 = vpop.eup %1283  ;;  %v822_v47 = vrot.slane %v1649_v32, %v821_v46 }
 0x402   : > { %v1286_v52 = vpop.eup %1285 }
 0x403   : > { %v669_v53 = vpack.c.bf16 %v1286_v52, %v1284_v51 }
 0x405   : > { %1162 = vmatmul.mubr.msk.bf16.gmra.mrb[28].mxu1 %vm521_vm5, %v669_v53 }
 0x406   : > { %1165 = vmatprep.mubr.msk.bf16.mxu1 %vm1408_vm0, %v1407_v0 }
 0x408   : > { %v1288_v54 = vpop.eup %1287 }
 0x40a   : > { %v1290_v55 = vpop.eup %1289 }
 0x40b   : > { %v670_v56 = vpack.c.bf16 %v1290_v55, %v1288_v54 }
 0x40d   : > { %1166 = vmatmul.mubr.msk.bf16.gmra.mrb[32].mxu1 %vm521_vm5, %v670_v56 }
 0x40e   : > { %1193 = vmatprep.mubr.msk.bf16.mxu1 %vm1408_vm0, %v1407_v0 }
 0x4d0   : > { %v717_v57 = vpop.f32.mrb[24].mxu1 }
 0x4d1   : > { %v1159_v58 = vpop.f32.mrb[25].mxu1 }
 0x4d2   : > { %v720_v59 = vpop.f32.mrb[26].mxu1  ;;  %v828_v58 = vmul.f32 0.0, %v822_v47 }
 0x4d3   : > { %v740_v60 = vpack.c.bf16 %v720_v59, %v717_v57  ;;  %v1160_v61 = vpop.f32.mrb[27].mxu1  ;;  %v827_v57 = vmul.f32 %v1654_v45, %v822_v47 }
 0x4d5   : > { %1170 = vmatpush3.bf16.msra.mxu0 %v740_v60 }
 0x4d6   : > { %1171 = vmatprep.subr.bf16.mxu0 %v1407_v0 }
 0x4d8   : > { %v725_v62 = vpop.f32.mrb[28].mxu1 }
 0x4d9   : > { %v1163_v63 = vpop.f32.mrb[29].mxu1 }
 0x4da   : > { %v728_v1 = vpop.f32.mrb[30].mxu1 }
 0x4db   : > { %v741_v2 = vpack.c.bf16 %v728_v1, %v725_v62  ;;  %v1164_v3 = vpop.f32.mrb[31].mxu1 }
 0x4dd   : > { %1172 = vmatpush3.bf16.msra.mxu0 %v741_v2 }
 0x4de   : > { %1173 = vmatprep.subr.bf16.mxu0 %v1407_v0 }
 0x4e0   : > { %v733_v4 = vpop.f32.mrb[32].mxu1 }
 0x4e1   : > { %v1167_v5 = vpop.f32.mrb[33].mxu1 }
 0x4e2   : > { %v736_v6 = vpop.f32.mrb[34].mxu1 }
 0x4e3   : > { %v742_v7 = vpack.c.bf16 %v736_v6, %v733_v4  ;;  %v1168_v8 = vpop.f32.mrb[35].mxu1 }
 0x4e5   : > { %1174 = vmatpush3.bf16.msra.mxu0 %v742_v7 }
 0x4e6   : > { %1187 = vmatprep.subr.bf16.mxu0 %v1407_v0 }
 0x4e8   : > { %1176 = vmatmul.mubr.msk.bf16.vlgmr.msra.gmra.mrb[24].mxu0 %vm445_vm3, %v1620_v25  ;;  %v267_v25 = vld [vmem:[%s1775_s3 + $0x10] sm:$0xff] }
 0x4e9   : > { %1179 = vmatprep.mubr.msk.bf16.mxu0 %vm1408_vm0, %v1407_v0  ;;  %v271_v9 = vpack.c.bf16 %v267_v25, %v267_v25 }
 0x4eb   : > { %v839_v10 = vsel %vm531_vm2, %v271_v9, 0 }
 0x4ec   : > { %1202 = vmatpush3.bf16.msra.mxu1 %v839_v10  ;;  %1188 = vmatpush3.bf16.msra.mxu0 %v839_v10 }
 0x4f0   : > { %1180 = vmatmul.mubr.msk.bf16.gmra.mrb[28].mxu0 %vm445_vm3, %v1630_v27  ;;  %v745_v27 = vsub.s32 2, %v1643_v30 }
 0x4f1   : > { %1183 = vmatprep.mubr.msk.bf16.mxu0 %vm1408_vm0, %v1407_v0 }
 0x4f2   : > { %v746_v11 = vrot.slane %v1649_v32, %v745_v27 }
 0x4f4   : > { %v751_v24 = vmul.f32 %v1654_v45, %v746_v11  ;;  %v752_v29 = vmul.f32 0.0, %v746_v11 }
 0x4f8   : > { %1184 = vmatmul.mubr.msk.bf16.gmra.mrb[32].mxu0 %vm445_vm3, %v1637_v28 }
 0x4f9   : > { %1189 = vmatprep.mubr.msk.bf16.mxu0 %vm1408_vm0, %v1407_v0 }
 0x5bb   : > { %v787_v12 = vpop.f32.mrb[24].mxu0 }
 0x5bc   : > { %v788_v28 = vadd.f32 %v787_v12, %v746_v11  ;;  %v1177_v13 = vpop.f32.mrb[25].mxu0 }
 0x5bd   : > { %v790_v14 = vpop.f32.mrb[26].mxu0 }
 0x5be   : > { %1291 = vtanh.f32 %v788_v28  ;;  %v791_v15 = vadd.f32 %v790_v14, %v746_v11  ;;  %v1178_v16 = vpop.f32.mrb[27].mxu0 }
 0x5c0   : > { %1293 = vtanh.f32 %v791_v15 }
 0x5c3   : > { %v795_v17 = vpop.f32.mrb[28].mxu0 }
 0x5c4   : > { %v796_v18 = vadd.f32 %v795_v17, %v746_v11  ;;  %v1181_v19 = vpop.f32.mrb[29].mxu0 }
 0x5c5   : > { %v798_v20 = vpop.f32.mrb[30].mxu0 }
 0x5c6   : > { %1295 = vtanh.f32 %v796_v18  ;;  %v799_v21 = vadd.f32 %v798_v20, %v746_v11  ;;  %v1182_v22 = vpop.f32.mrb[31].mxu0 }
 0x5c8   : > { %v1292_v23 = vpop.eup %1291  ;;  %1297 = vtanh.f32 %v799_v21 }
 0x5c9   : > { %1040 = vst.msk [vmem:[%s1724_s25 + $0x30] sm:$0xff] %vm521_vm5, %v1292_v23 }
 0x5ca   : > { %v1294_v26 = vpop.eup %1293 }
 0x5cb   : > { %v816_v31 = vpack.c.bf16 %v1294_v26, %v1292_v23  ;;  %v803_v33 = vpop.f32.mrb[32].mxu0  ;;  %1041 = vst.msk [vmem:[%s1724_s25 + $0x38] sm:$0xff] %vm521_vm5, %v1294_v26 }
 0x5cc   : > { %v804_v34 = vadd.f32 %v803_v33, %v751_v24  ;;  %v1185_v35 = vpop.f32.mrb[33].mxu0 }
 0x5cd   : > { %v806_v36 = vpop.f32.mrb[34].mxu0  ;;  %1190 = vmatmul.mubr.msk.bf16.vlgmr.msra.gmra.mrb[36].mxu0 %vm521_vm5, %v816_v31 }
 0x5ce   : > { %1299 = vtanh.f32 %v804_v34  ;;  %v807_v37 = vadd.f32 %v806_v36, %v752_v29  ;;  %v1186_v38 = vpop.f32.mrb[35].mxu0 }
 0x5d0   : > { %v1296_v39 = vpop.eup %1295  ;;  %1301 = vtanh.f32 %v807_v37 }
 0x5d1   : > { %1042 = vst.msk [vmem:[%s1724_s25 + $0x40] sm:$0xff] %vm521_vm5, %v1296_v39 }
 0x5d2   : > { %v1298_v40 = vpop.eup %1297 }
 0x5d3   : > { %v817_v41 = vpack.c.bf16 %v1298_v40, %v1296_v39  ;;  %1043 = vst.msk [vmem:[%s1724_s25 + $0x48] sm:$0xff] %vm521_vm5, %v1298_v40 }
 0x5d5   : > { %1194 = vmatmul.mubr.msk.bf16.vlgmr.msra.gmra.mrb[36].mxu1 %vm521_vm5, %v817_v41 }
 0x5d6   : > { %1197 = vmatprep.mubr.msk.bf16.mxu1 %vm1408_vm0, %v1407_v0 }
 0x5d8   : > { %v1300_v42 = vpop.eup %1299 }
 0x5d9   : > { %1044 = vst.msk [vmem:[%s1724_s25 + $0x50] sm:$0xff] %vm521_vm5, %v1300_v42 }
 0x5da   : > { %v1302_v43 = vpop.eup %1301 }
 0x5db   : > { %v818_v44 = vpack.c.bf16 %v1302_v43, %v1300_v42  ;;  %1045 = vst.msk [vmem:[%s1724_s25 + $0x58] sm:$0xff] %vm521_vm5, %v1302_v43 }
 0x5dd   : > { %1198 = vmatmul.mubr.msk.bf16.gmra.mrb[40].mxu1 %vm521_vm5, %v818_v44 }
 0x6a0   : > { %v875_v48 = vpop.f32.mrb[36].mxu0 }
 0x6a1   : > { %v876_v49 = vadd.f32 %v875_v48, %v822_v47  ;;  %v1191_v50 = vpop.f32.mrb[37].mxu0 }
 0x6a2   : > { %v878_v0 = vpop.f32.mrb[38].mxu0 }
 0x6a3   : > { %898 = vst.msk [vmem:[%s1724_s25] sm:$0xff] %vm521_vm5, %v876_v49  ;;  %v879_v51 = vadd.f32 %v878_v0, %v822_v47  ;;  %v1192_v52 = vpop.f32.mrb[39].mxu0 }
 0x6a5   : > { %899 = vst.msk [vmem:[%s1724_s25 + $0x8] sm:$0xff] %vm521_vm5, %v879_v51 }
 0x6a8   : > { %v883_v53 = vpop.f32.mrb[36].mxu1 }
 0x6a9   : > { %v884_v54 = vadd.f32 %v883_v53, %v822_v47  ;;  %v1195_v55 = vpop.f32.mrb[37].mxu1 }
 0x6aa   : > { %v886_v56 = vpop.f32.mrb[38].mxu1 }
 0x6ab   : > { %900 = vst.msk [vmem:[%s1724_s25 + $0x10] sm:$0xff] %vm521_vm5, %v884_v54  ;;  %v887_v30 = vadd.f32 %v886_v56, %v822_v47  ;;  %v1196_v32 = vpop.f32.mrb[39].mxu1 }
 0x6ad   : > { %901 = vst.msk [vmem:[%s1724_s25 + $0x18] sm:$0xff] %vm521_vm5, %v887_v30 }
 0x6b0   : > { %v891_v59 = vpop.f32.mrb[40].mxu1 }
 0x6b1   : > { %v892_v60 = vadd.f32 %v891_v59, %v827_v57  ;;  %v1199_v61 = vpop.f32.mrb[41].mxu1 }
 0x6b2   : > { %v894_v62 = vpop.f32.mrb[42].mxu1 }
 0x6b3   : > { %902 = vst.msk [vmem:[%s1724_s25 + $0x20] sm:$0xff] %vm521_vm5, %v892_v60  ;;  %v895_v63 = vadd.f32 %v894_v62, %v828_v58  ;;  %v1200_v1 = vpop.f32.mrb[43].mxu1 }
 0x6b5   : > { %903 = vst.msk [vmem:[%s1724_s25 + $0x28] sm:$0xff] %vm521_vm5, %v895_v63 }
 0x6b6 PF: > { %p17_p11 = scmp.ge.s32.totalorder %s1456_s20, 6   ;;  %s1783_s15 = smov %s1393_s16 }
 0x6b7   : > { %s1784_s16 = smov %s1397_s17  ;;  %s1785_s17 = smov %s1466_s23 }
 0x6b8   : > { %s1786_s18 = smov %s1456_s20  ;;  %19 = sbr.rel (!%p17_p11) target bundleno = 5 (0x5), region = 90 }
 0x6bf   :  { %932 = vsyncpa [#allocation3], 1 }
 0x6c0   :  { %934 = vsyncpa [#allocation3 + $0x1], 1 }
 0x6c1   :  { %935 = vsyncpa [#allocation5], 1 }
 0x6c2   :  { %937 = vsyncpa [#allocation5 + $0x1], 1 }

</bundles_post_ra>
